<compile_context>
chip_gen: v5e
topology: v5e:2x2
jax: 0.10.0
libtpu: 0.0.40
codegen_flags: <defaults>
</compile_context>

<pallas_src>
import functools

import jax
import jax.numpy as jnp
from jax import lax
from jax.experimental import pallas as pl
from jax.experimental.pallas import tpu as pltpu

LANE = 128  # lane width; channel dims are zero-padded to 128 (exact: pads contribute 0)


def _vmem_limit(needed_bytes):
    # Explicit VMEM budget (review): v5e default scoped limit is 16 MiB, v7x
    # physical VMEM is 64 MiB.  Ask for what we need plus headroom, floor at
    # 32 MiB, cap well under v5e/v6e physical.
    return int(min(112 * 1024 * 1024, max(needed_bytes + (4 << 20), 32 << 20)))


# --------------------------------------------------------------------------
# Pass 1: fused lane-padded projection  x @ [wq*scale | wk | wv@wo] + b
# --------------------------------------------------------------------------
def _proj_kernel(x_ref, w_ref, b_ref, qkv_ref):
    x = x_ref[0]                                                   # (tp, Cin) bf16
    proj = jnp.dot(x, w_ref[...], preferred_element_type=jnp.float32)
    qkv_ref[0] = (proj + b_ref[...]).astype(qkv_ref.dtype)         # (tp, 3*LANE)


# --------------------------------------------------------------------------
# Pass 2: flash attention over the whole image for one q tile.
# K/V for the full image live in VMEM (pipelined in by BlockSpec); the key
# reduction is an in-kernel fori_loop with loop-carried online-softmax state.
# --------------------------------------------------------------------------
def _attn_kernel(q_ref, k_ref, v_ref, o_ref, *, tk, n_k, unroll):
    q = q_ref[0]                                                   # (tq, LANE) bf16
    tq = q.shape[0]

    def body(i, carry):
        m, l, acc = carry
        row = pl.multiple_of(i * tk, tk)
        k = k_ref[0, pl.ds(row, tk), :]                            # (tk, LANE) bf16
        v = v_ref[0, pl.ds(row, tk), :]                            # (tk, LANE) bf16
        # 1/sqrt(Ck) already folded into wq/bq; padded lanes contribute 0.
        s = lax.dot_general(q, k, (((1,), (1,)), ((), ())),
                            preferred_element_type=jnp.float32)    # (tq, tk) f32
        m_new = jnp.maximum(m, jnp.max(s, axis=-1, keepdims=True))
        alpha = jnp.exp(m - m_new)
        p = jnp.exp(s - m_new)
        l_new = alpha * l + jnp.sum(p, axis=-1, keepdims=True)
        acc_new = alpha * acc + jnp.dot(p.astype(v.dtype), v,
                                        preferred_element_type=jnp.float32)
        return m_new, l_new, acc_new

    m0 = jnp.full((tq, 1), -jnp.inf, jnp.float32)
    l0 = jnp.zeros((tq, 1), jnp.float32)
    acc0 = jnp.zeros((tq, LANE), jnp.float32)
    m, l, acc = lax.fori_loop(0, n_k, body, (m0, l0, acc0), unroll=unroll)

    # wo is folded into V, so finalize is just the softmax normalization
    # (one EUP reciprocal on the small (tq, LANE) accumulator).
    o_ref[0] = acc * pl.reciprocal(l, approx=True)


def pam_forward(x_nchw, params, *, tq=256, tk=512, tp=512,
                compute_dtype=jnp.bfloat16):
    """x_nchw: (N, Cin, H, 2W) float32.  Returns (N, Cout, H, 2W) float32."""
    wq, bq, wk, bk, wv, bv, wo = params
    del bk  # key bias is a per-query constant inside the softmax -> dropped (exact)
    N, Cin, H, W2 = x_nchw.shape
    L = H * W2
    Ck = wq.shape[1]
    Cv = wv.shape[1]
    Cout = wo.shape[1]
    assert Ck <= LANE and Cv <= LANE and Cout <= LANE

    tq, tk, tp = min(tq, L), min(tk, L), min(tp, L)
    # TODO(synk): L not divisible by the tile sizes would need masked tiles.
    assert L % tq == 0 and L % tk == 0 and L % tp == 0, (L, tq, tk, tp)
    n_q, n_k, n_p = L // tq, L // tk, L // tp

    scale = float(Ck) ** -0.5                      # folded into query projection
    wvo = wv @ wo                                  # output conv folded into value
    bvo = bv.reshape(1, Cv) @ wo                   # (softmax rows sum to 1 -> exact)

    # Fused, lane-padded projection weight [wq*scale | wk | wv@wo] -> (Cin, 3*LANE).
    w_all = jnp.zeros((Cin, 3 * LANE), jnp.float32)
    w_all = w_all.at[:, 0:Ck].set(wq * scale)
    w_all = w_all.at[:, LANE:LANE + Ck].set(wk)
    w_all = w_all.at[:, 2 * LANE:2 * LANE + Cout].set(wvo)
    b_all = jnp.zeros((1, 3 * LANE), jnp.float32)
    b_all = b_all.at[:, 0:Ck].set(bq.reshape(1, Ck) * scale)
    b_all = b_all.at[:, 2 * LANE:2 * LANE + Cout].set(bvo)

    # NCHW -> (N, L, Cin); bf16 operands for the MXU (softmax stats stay f32).
    x = jnp.transpose(x_nchw, (0, 2, 3, 1)).reshape(N, L, Cin).astype(compute_dtype)
    w_all = w_all.astype(compute_dtype)
    itemsize = jnp.dtype(compute_dtype).itemsize

    # ---- Pass 1: projection. Both grid axes fully parallel (megacore). ----
    vmem1 = (2 * tp * Cin * itemsize + 2 * tp * 3 * LANE * itemsize
             + Cin * 3 * LANE * itemsize + 3 * LANE * 4)
    qkv = pl.pallas_call(
        _proj_kernel,
        out_shape=jax.ShapeDtypeStruct((N, L, 3 * LANE), compute_dtype),
        grid=(N, n_p),
        in_specs=[
            pl.BlockSpec((1, tp, Cin), lambda n, i: (n, i, 0)),
            pl.BlockSpec((Cin, 3 * LANE), lambda n, i: (0, 0)),
            pl.BlockSpec((1, 3 * LANE), lambda n, i: (0, 0)),
        ],
        out_specs=pl.BlockSpec((1, tp, 3 * LANE), lambda n, i: (n, i, 0)),
        compiler_params=pltpu.CompilerParams(
            dimension_semantics=("parallel", "parallel"),
            vmem_limit_bytes=_vmem_limit(vmem1)),
    )(x, w_all, b_all)

    # ---- Pass 2: flash attention. qkv passed three times; Q is tiled per q
    # tile, K/V blocks are the whole image (index_map constant across qi, so
    # Pallas re-DMAs them only when the batch index changes). ----
    vmem2 = (2 * tq * LANE * itemsize            # Q (double-buffered)
             + 2 * 2 * L * LANE * itemsize       # K, V (double-buffered)
             + 2 * tq * LANE * 4)                # output (double-buffered)
    cost = pl.CostEstimate(
        flops=2 * N * (L * Cin * 3 * LANE + 2 * L * L * LANE),
        transcendentals=N * L * L,
        bytes_accessed=N * L * 3 * LANE * itemsize + N * L * LANE * 4,
    )
    kernel = functools.partial(_attn_kernel, tk=tk, n_k=n_k,
                               unroll=True if n_k <= 8 else False)
    out = pl.pallas_call(
        kernel,
        out_shape=jax.ShapeDtypeStruct((N, L, LANE), jnp.float32),
        grid=(N, n_q),
        in_specs=[
            pl.BlockSpec((1, tq, LANE), lambda n, qi: (n, qi, 0)),  # Q lanes
            pl.BlockSpec((1, L, LANE), lambda n, qi: (n, 0, 1)),    # K lanes
            pl.BlockSpec((1, L, LANE), lambda n, qi: (n, 0, 2)),    # V lanes
        ],
        out_specs=pl.BlockSpec((1, tq, LANE), lambda n, qi: (n, qi, 0)),
        compiler_params=pltpu.CompilerParams(
            dimension_semantics=("parallel", "parallel"),
            vmem_limit_bytes=_vmem_limit(vmem2)),
        cost_estimate=cost,
    )(qkv, qkv, qkv)

    out = out[:, :, :Cout]                                   # drop lane padding
    return jnp.transpose(out.reshape(N, H, W2, Cout), (0, 3, 1, 2))


def init_params(key, in_channels, out_channels):
    """Deterministic synthetic parameters. 1x1 convs stored as (Cin, Cout)
    matmul weights; query/key BN (inference mode) folded into the conv."""
    key_channels = out_channels // 8
    value_channels = out_channels
    eps = 1e-5
    ks = jax.random.split(key, 16)

    def folded_conv_bn(kw, kb, kg, kbe, km, kv, cin, cout):
        w = 0.1 * jax.random.normal(kw, (cin, cout), jnp.float32)
        b = 0.1 * jax.random.normal(kb, (cout,), jnp.float32)
        gamma = 1.0 + 0.1 * jax.random.normal(kg, (cout,), jnp.float32)
        beta = 0.1 * jax.random.normal(kbe, (cout,), jnp.float32)
        mean = 0.1 * jax.random.normal(km, (cout,), jnp.float32)
        var = 1.0 + jnp.abs(jax.random.normal(kv, (cout,), jnp.float32))
        s = gamma / jnp.sqrt(var + eps)
        return w * s[None, :], ((b - mean) * s + beta).reshape(1, cout)

    wq, bq = folded_conv_bn(*ks[0:6], in_channels, key_channels)
    wk, bk = folded_conv_bn(*ks[6:12], in_channels, key_channels)
    wv = 0.1 * jax.random.normal(ks[12], (in_channels, value_channels), jnp.float32)
    bv = (0.1 * jax.random.normal(ks[13], (value_channels,), jnp.float32)
          ).reshape(1, value_channels)
    wo = 0.1 * jax.random.normal(ks[14], (value_channels, out_channels), jnp.float32)
    return (wq, bq, wk, bk, wv, bv, wo)


def pam_ref(x_nchw, params):
    """Pure-JAX f32 reference of the original forward pass (for validation)."""
    wq, bq, wk, bk, wv, bv, wo = params
    N, C, H, W2 = x_nchw.shape
    L = H * W2
    Ck = wq.shape[1]
    x = jnp.transpose(x_nchw, (0, 2, 3, 1)).reshape(N, L, C)
    q = x @ wq + bq
    k = x @ wk + bk
    v = x @ wv + bv
    sim = jnp.einsum("nlc,nmc->nlm", q, k) * (float(Ck) ** -0.5)
    p = jax.nn.softmax(sim, axis=-1)
    ctx = jnp.einsum("nlm,nmc->nlc", p, v)
    out = ctx @ wo
    return jnp.transpose(out.reshape(N, H, W2, -1), (0, 3, 1, 2))


if __name__ == "__main__":
    # Small shapes. PAM's final conv requires in_channels == out_channels for
    # the PyTorch module to run — matched here. feats: (N, C, H, 2*W), W = 8.
    N, C, H, W2 = 2, 32, 8, 16
    out_channels = 32                   # key_channels = out_channels // 8 = 4

    key = jax.random.PRNGKey(0)
    k_x, k_p = jax.random.split(key)
    feats = jax.random.normal(k_x, (N, C, H, W2), jnp.float32)
    params = init_params(k_p, C, out_channels)

    out = jax.block_until_ready(pam_forward(feats, params))
    ref = pam_ref(feats, params)

    assert out.shape == (N, out_channels, H, W2)
    # Tolerance covers bf16 MXU operands + approx reciprocal; scale / key-bias /
    # output-conv folds are algebraic identities.
    max_err = float(jnp.max(jnp.abs(out - ref)))
    assert jnp.allclose(out, ref, atol=3e-2, rtol=3e-2), max_err

    print("KERNEL_OK")
</pallas_src>

<mosaic_0001>
module attributes {stable_mosaic.version = 11 : i64} {
  func.func @_proj_kernel(%arg0: i32, %arg1: i32, %arg2: memref<1x128x32xbf16, #tpu.memory_space<vmem>>, %arg3: memref<32x384xbf16, #tpu.memory_space<vmem>>, %arg4: memref<1x384xf32, #tpu.memory_space<vmem>>, %arg5: memref<1x128x384xbf16, #tpu.memory_space<vmem>>) attributes {dimension_semantics = [#tpu.dimension_semantics<parallel>, #tpu.dimension_semantics<parallel>], iteration_bounds = array<i64: 2, 1>, scalar_prefetch = 0 : i64, scratch_operands = 0 : i64, tpu.core_type = #tpu.core_type<tc>, window_params = [{transform_indices = @transform_0, window_bounds = array<i64: 1, 128, 32>}, {pipeline_mode = #tpu.pipeline_mode<synchronous>, transform_indices = @transform_1, window_bounds = array<i64: 32, 384>}, {pipeline_mode = #tpu.pipeline_mode<synchronous>, transform_indices = @transform_2, window_bounds = array<i64: 1, 384>}, {transform_indices = @transform_3, window_bounds = array<i64: 1, 128, 384>}]} {
    %c0 = arith.constant 0 : index
    %c0_0 = arith.constant 0 : index
    %c0_1 = arith.constant 0 : index
    %0 = vector.load %arg2[%c0, %c0_0, %c0_1] : memref<1x128x32xbf16, #tpu.memory_space<vmem>>, vector<1x128x32xbf16>
    %1 = vector.shape_cast %0 : vector<1x128x32xbf16> to vector<128x32xbf16>
    %c0_2 = arith.constant 0 : index
    %c0_3 = arith.constant 0 : index
    %2 = vector.load %arg3[%c0_2, %c0_3] : memref<32x384xbf16, #tpu.memory_space<vmem>>, vector<32x384xbf16>
    %cst = arith.constant dense<0.000000e+00> : vector<128x384xf32>
    %3 = tpu.matmul %1, %2, %cst {dimension_numbers = #tpu.dot_dimension_numbers<[1], [0], [0], [1], [0, 0, 1, 1], [], []>} : vector<128x32xbf16>, vector<32x384xbf16>, vector<128x384xf32> -> vector<128x384xf32>
    %c0_4 = arith.constant 0 : index
    %c0_5 = arith.constant 0 : index
    %4 = vector.load %arg4[%c0_4, %c0_5] : memref<1x384xf32, #tpu.memory_space<vmem>>, vector<1x384xf32>
    %5 = vector.broadcast %4 : vector<1x384xf32> to vector<128x384xf32>
    %6 = arith.addf %3, %5 : vector<128x384xf32>
    %7 = arith.truncf %6 : vector<128x384xf32> to vector<128x384xbf16>
    %c0_6 = arith.constant 0 : index
    %c0_7 = arith.constant 0 : index
    %c0_8 = arith.constant 0 : index
    %8 = vector.load %arg5[%c0_6, %c0_7, %c0_8] : memref<1x128x384xbf16, #tpu.memory_space<vmem>>, vector<1x128x384xbf16>
    %9 = vector.shape_cast %8 : vector<1x128x384xbf16> to vector<128x384xbf16>
    %10 = vector.shape_cast %7 : vector<128x384xbf16> to vector<1x128x384xbf16>
    tpu.vector_store %arg5[%c0_6, %c0_7, %c0_8], %10 {strides = array<i32>} : memref<1x128x384xbf16, #tpu.memory_space<vmem>>, vector<1x128x384xbf16>,
    return
  }
  func.func @transform_0(%arg0: i32, %arg1: i32) -> (i32, i32, i32) {
    %c0_i32 = arith.constant 0 : i32
    %c0_i32_0 = arith.constant 0 : i32
    return %arg0, %arg1, %c0_i32 : i32, i32, i32
  }
  func.func @transform_1(%arg0: i32, %arg1: i32) -> (i32, i32) {
    %c0_i32 = arith.constant 0 : i32
    %c0_i32_0 = arith.constant 0 : i32
    %c0_i32_1 = arith.constant 0 : i32
    return %c0_i32, %c0_i32_0 : i32, i32
  }
  func.func @transform_2(%arg0: i32, %arg1: i32) -> (i32, i32) {
    %c0_i32 = arith.constant 0 : i32
    %c0_i32_0 = arith.constant 0 : i32
    %c0_i32_1 = arith.constant 0 : i32
    return %c0_i32, %c0_i32_0 : i32, i32
  }
  func.func @transform_3(%arg0: i32, %arg1: i32) -> (i32, i32, i32) {
    %c0_i32 = arith.constant 0 : i32
    %c0_i32_0 = arith.constant 0 : i32
    return %arg0, %arg1, %c0_i32 : i32, i32, i32
  }
}

</mosaic_0001>

<bundles_post_ra>
// kernel: tpu_custom_call.1
= control target key start
LH: loop header
LB: loop body
LE: loop exit
PB: predicated region body
PF: predicated region fallthrough
CT: control target
= control target key end

     0   :  { %8 = vsyncpa [#allocation3], 0  ;;  %s1174_s0 = inlined_call_operand.vmem [shape: bf16[2,128,32], index: 0, kind: input, shape index: {}]   ;;  %s1175_s1 = inlined_call_operand.vmem [shape: bf16[32,384], index: 1, kind: input, shape index: {}]   ;;  %s1176_s2 = inlined_call_operand.vmem [shape: f32[1,384], index: 2, kind: input, shape index: {}]   ;;  %s1177_s3 = inlined_call_operand.hbm [shape: bf16[2,128,384], index: 3, kind: output, shape index: {}]  }
   0x1   :  { %10 = vsyncpa [#allocation3 + $0x1], 0  ;;  %s911_s12 = smov 0   ;;  %s913_s13 = smov 0  }
   0x2   :  { %s915_s14 = smov 0   ;;  %s917_s15 = smov 0  }
   0x3   :  { %s919_s16 = smov 0   ;;  %s921_s17 = smov 0  }
   0x4 LB: > { %s639_s18 = sadd.s32 4294967295, %s887_s17   ;;  %s640_s19 = sadd.s32 4294967294, %s887_s17   ;;  %s887_s17 = sphi %s921_s17, %s16_s17   ;;  %s883_s16 = sphi %s919_s16, %s1184_s16   ;;  %s879_s15 = sphi %s917_s15, %s1183_s15   ;;  %s875_s14 = sphi %s915_s14, %s1182_s14   ;;  %s871_s13 = sphi %s913_s13, %s1181_s13   ;;  %s867_s12 = sphi %s911_s12, %s1180_s12  }
   0x5   : > { %s28_s20 = sadd.s32 1, %s883_s16  ;;  %s107_s21 = sadd.s32 1, %s875_s14 }
   0x6   : > { %p30_p0 = scmp.ge.s32.totalorder %s28_s20, 2  ;;  %p117_p1 = scmp.ne.s32.totalorder %s875_s14, %s871_s13 }
   0x7   : > { %p118_p2 = scmp.eq.s32.totalorder %s639_s18, 1  ;;  %p123_p3 = scmp.ne.s32.totalorder %s871_s13, %s867_s12 }
   0x8   : > { %s1186_s20 = smov (%p30_p0, %s28_s20), 0  ;;  %p124_p5 = scmp.eq.s32.totalorder %s640_s19, 1 }
   0x9   : > { %p951_p4 = por %p118_p2, %p117_p1  ;;  %s102_s23 = ssub.s32 %s883_s16, %s1186_s20 }
   0xa   : > { %p643_p6 = scmp.ge.s32.totalorder %s887_s17, 1  ;;  %p105_p7 = scmp.eq.s32.totalorder %s102_s23, 0 }
   0xb   : > { %p958_p8 = por %p124_p5, %p123_p3  ;;  %p161_p9 = scmp.lt.s32.totalorder %s887_s17, 3 }
   0xc   : > { %s964_s25 = scalar_select %p105_p7, %s875_s14, %s107_s21  }
   0xd   : > { %p162_p10 = pnand %p643_p6, %p161_p9 }
   0xe   : > { %p190_p11 = scmp.lt.s32.totalorder (!%p162_p10), %s879_s15, 1  ;;  %s186_s19 = sand.u32 (!%p162_p10), 1, %s871_s13  }
   0xf   : > { %165 = sbr.rel (%p162_p10) target bundleno = 260 (0x104), region = 32  ;;  %s542_s4 = scalar_lea.sflag (!%p162_p10), [#allocation3], %s186_s19 }
  0x10   : > { %s750_s21 = smul.u32 (!%p162_p10), 192, %s186_s19  ;;  %s829_s9 = scalar_lea.hbm (!%p162_p10), %s1177_s3, 384 }
  0x11   : > { %s751_s26 = smul.u32 (!%p162_p10), 192, %s879_s15 }
  0x12   : > { %s1055_s23 = scalar_lea.vmem (!%p162_p10), [#allocation2], %s750_s21 }
  0x13   : > { %s556_s29 = scalar_lea.hbm (!%p162_p10), %s1177_s3, %s751_s26 }
  0x14   : > { %v692_v0 = vld [vmem:[%s1175_s1 + $0x18] sm:$0xf]  ;;  %v742_v1 = vld [vmem:[%s1175_s1 + $0x20] sm:$0xf0]  ;;  %v741_v2 = vld [vmem:[%s1175_s1 + $0x1c] sm:$0xf] }
  0x15   : > { %v693_v3 = vor.u32 %v742_v1, %v692_v0  ;;  %v694_v4 = vld [vmem:[%s1175_s1 + $0x24] sm:$0xf0]  ;;  %v700_v5 = vld [vmem:[%s1175_s1 + $0x20] sm:$0xf]  ;;  %v743_v6 = vld [vmem:[%s1175_s1 + $0x28] sm:$0xf0] }
  0x16   : > { %v697_v7 = vor.u32 %v741_v2, %v694_v4  ;;  %v701_v8 = vor.u32 %v743_v6, %v700_v5  ;;  %v680_v9 = vld [vmem:[%s1175_s1] sm:$0xf]  ;;  %v739_v10 = vld [vmem:[%s1175_s1 + $0x8] sm:$0xf0]  ;;  %v738_v11 = vld [vmem:[%s1175_s1 + $0x4] sm:$0xf] }
  0x17   : > { %336 = vmatpush.bf16.msra.mxu0 %v693_v3  ;;  %744 = vmatpush.bf16.msra.mxu3 %v693_v3  ;;  %v681_v12 = vor.u32 %v739_v10, %v680_v9  ;;  %v682_v13 = vld [vmem:[%s1175_s1 + $0xc] sm:$0xf0]  ;;  %v688_v14 = vld [vmem:[%s1175_s1 + $0x8] sm:$0xf]  ;;  %v740_v15 = vld [vmem:[%s1175_s1 + $0x10] sm:$0xf0] }
  0x18   : > { %385 = vmatpush.bf16.msra.mxu1 %v697_v7  ;;  %434 = vmatpush.bf16.msra.mxu2 %v701_v8  ;;  %v685_v16 = vor.u32 %v738_v11, %v682_v13  ;;  %v689_v17 = vor.u32 %v740_v15, %v688_v14  ;;  %s191_s6 = scalar_select %p190_p11, %s879_s15, 1  ;;  %vm305_vm0 = vcmask 261120   ;;  %v225_v26 = vld [vmem:[%s1176_s2] sm:$0x7] }
  0x19   : > { %v1045_v27 = vperm.slane %v225_v26, 0  ;;  %v1047_v28 = vperm.slane %v225_v26, 1  ;;  %v1053_v34 = vperm.slane %v225_v26, 2  ;;  %s557_s15 = sshll.u32 %s1055_s23, 4  ;;  %s559_s30 = sshll.u32 %s556_s29, 4  ;;  %s558_s15 = int_to_ptr.vmem [resolvable:$true] %s557_s15  ;;  %s560_s30 = int_to_ptr.hbm [resolvable:$true] %s559_s30 }
  0x1a   : > { %s729_s7 = sshll.u32 %s191_s6, 6  ;;  %s823_s5 = sshra.s32 %s560_s30, 4  ;;  %s824_s5 = int_to_ptr.hbm [resolvable:$true] %s823_s5 }
  0x1b   : > { %337 = vmatpush.bf16.msra.mxu0 %v681_v12  ;;  %745 = vmatpush.bf16.msra.mxu3 %v681_v12  ;;  %s1007_s10 = scalar_lea.vmem %s1174_s0, %s729_s7  ;;  %s825_s6 = scalar_lea.hbm %s824_s5, 192 }
  0x1c   : > { %386 = vmatpush.bf16.msra.mxu1 %v685_v16  ;;  %435 = vmatpush.bf16.msra.mxu2 %v689_v17  ;;  %v730_v18 = vld [vmem:[%s1007_s10] sm:$0xff]  ;;  %v736_v19 = vld [vmem:[%s1007_s10 + $0x30] sm:$0xff]  ;;  %v731_v20 = vld [vmem:[%s1007_s10 + $0x8] sm:$0xff]  ;;  %p826_p12 = scmp.ne.s32.totalorder %s824_s5, %s825_s6  ;;  %p830_p1 = scmp.lt.s32.totalorder %s824_s5, %s1177_s3 }
  0x1d   : > { %v737_v21 = vld [vmem:[%s1007_s10 + $0x38] sm:$0xff]  ;;  %v732_v22 = vld [vmem:[%s1007_s10 + $0x10] sm:$0xff]  ;;  %v734_v24 = vld [vmem:[%s1007_s10 + $0x20] sm:$0xff]  ;;  %p831_p2 = scmp.lt.s32.totalorder %s829_s9, %s825_s6 }
  0x1e   : > { %702 = vmatmul.msk.bf16.vlgmr.msra.gmra.mxu0 %vm305_vm0, %v730_v18  ;;  %708 = vmatmul.msk.bf16.vlgmr.msra.gmra.mxu3 %vm305_vm0, %v736_v19  ;;  %v733_v23 = vld [vmem:[%s1007_s10 + $0x18] sm:$0xff]  ;;  %v735_v25 = vld [vmem:[%s1007_s10 + $0x28] sm:$0xff]  ;;  %p827_p13 = pnand %p826_p12, %p951_p4 }
  0x1f   : > { %746 = vmatpush.bf16.msrb.mxu3 %v697_v7  ;;  %710 = vmatmul.msk.bf16.vlgmr.msra.gmra.mxu1 %vm305_vm0, %v730_v18  ;;  %p832_p3 = por %p831_p2, %p830_p1 }
  0x20   : > { %718 = vmatmul.msk.bf16.vlgmr.msra.gmra.mxu2 %vm305_vm0, %v730_v18  ;;  %p828_p0 = pneg %p827_p13 }
  0x22   : > { %p833_p5 = pnand %p832_p3, %p828_p0 }
  0x23   : > { %747 = vmatpush.bf16.msrb.mxu3 %v685_v16 }
  0x27   : > { %748 = vmatpush.bf16.msra.mxu3 %v701_v8 }
  0x2b   : > { %749 = vmatpush.bf16.msra.mxu3 %v689_v17 }
  0x2e   : > { %703 = vmatmul.msk.bf16.gmra.mxu0 %vm305_vm0, %v731_v20  ;;  %709 = vmatmul.msk.bf16.gmra.mxu3 %vm305_vm0, %v737_v21 }
  0x2f   : > { %711 = vmatmul.msk.bf16.gmra.mxu1 %vm305_vm0, %v731_v20 }
  0x30   : > { %719 = vmatmul.msk.bf16.gmra.mxu2 %vm305_vm0, %v731_v20 }
  0x3e   : > { %704 = vmatmul.msk.bf16.gmra.mxu0 %vm305_vm0, %v732_v22  ;;  %716 = vmatmul.msk.bf16.vlgmr.msrb.gmra.mxu3 %vm305_vm0, %v736_v19 }
  0x3f   : > { %712 = vmatmul.msk.bf16.gmra.mxu1 %vm305_vm0, %v732_v22 }
  0x40   : > { %720 = vmatmul.msk.bf16.gmra.mxu2 %vm305_vm0, %v732_v22 }
  0x4e   : > { %705 = vmatmul.msk.bf16.gmra.mxu0 %vm305_vm0, %v733_v23  ;;  %717 = vmatmul.msk.bf16.gmra.mxu3 %vm305_vm0, %v737_v21 }
  0x4f   : > { %713 = vmatmul.msk.bf16.gmra.mxu1 %vm305_vm0, %v733_v23 }
  0x50   : > { %721 = vmatmul.msk.bf16.gmra.mxu2 %vm305_vm0, %v733_v23 }
  0x5e   : > { %706 = vmatmul.msk.bf16.gmra.mxu0 %vm305_vm0, %v734_v24  ;;  %724 = vmatmul.msk.bf16.vlgmr.msra.gmra.mxu3 %vm305_vm0, %v736_v19 }
  0x5f   : > { %714 = vmatmul.msk.bf16.gmra.mxu1 %vm305_vm0, %v734_v24 }
  0x60   : > { %722 = vmatmul.msk.bf16.gmra.mxu2 %vm305_vm0, %v734_v24 }
  0x6e   : > { %707 = vmatmul.msk.bf16.gmra.mxu0 %vm305_vm0, %v735_v25  ;;  %725 = vmatmul.msk.bf16.gmra.mxu3 %vm305_vm0, %v737_v21 }
  0x6f   : > { %715 = vmatmul.msk.bf16.gmra.mxu1 %vm305_vm0, %v735_v25 }
  0x70   : > { %723 = vmatmul.msk.bf16.gmra.mxu2 %vm305_vm0, %v735_v25 }
  0x9b   : > { %v339_v29 = vpop.f32.mrf.mxu0 }
  0x9c   : > { %v340_v30 = vadd.f32 %v339_v29, %v1045_v27  ;;  %v388_v31 = vpop.f32.mrf.mxu1 }
  0x9d   : > { %v389_v32 = vadd.f32 %v388_v31, %v1047_v28 }
  0x9f   : > { %v477_v33 = vpack.c.bf16 %v389_v32, %v340_v30 }
  0xa1   : > { %509 = vst [vmem:[%s1055_s23] sm:$0xff] %v477_v33  ;;  %v369_v35 = vpop.f32.mrf.mxu3 }
  0xa2   : > { %v370_v8 = vadd.f32 %v369_v35, %v1045_v27 }
  0xa3   : > { %v437_v36 = vpop.f32.mrf.mxu2  ;;  %v341_v38 = vpop.f32.mrf.mxu0 }
  0xa4   : > { %v438_v37 = vadd.f32 %v437_v36, %v1053_v34  ;;  %v342_v39 = vadd.f32 %v341_v38, %v1045_v27  ;;  %v390_v40 = vpop.f32.mrf.mxu1 }
  0xa5   : > { %v391_v42 = vadd.f32 %v390_v40, %v1047_v28 }
  0xa6   : > { %v478_v41 = vpack.c.bf16 %v438_v37, %v438_v37 }
  0xa7   : > { %v479_v43 = vpack.c.bf16 %v391_v42, %v342_v39 }
  0xa8   : > { %510 = vst [vmem:[%s1055_s23 + $0x8] sm:$0xf] %v478_v41 }
  0xa9   : > { %511 = vst [vmem:[%s1055_s23 + $0xc] sm:$0xff] %v479_v43  ;;  %v371_v44 = vpop.f32.mrf.mxu3 }
  0xaa   : > { %v372_v20 = vadd.f32 %v371_v44, %v1045_v27 }
  0xab   : > { %v439_v45 = vpop.f32.mrf.mxu2  ;;  %v344_v47 = vpop.f32.mrf.mxu0 }
  0xac   : > { %v440_v46 = vadd.f32 %v439_v45, %v1053_v34  ;;  %v345_v48 = vadd.f32 %v344_v47, %v1045_v27  ;;  %v393_v49 = vpop.f32.mrf.mxu1 }
  0xad   : > { %v394_v51 = vadd.f32 %v393_v49, %v1047_v28 }
  0xae   : > { %v480_v50 = vpack.c.bf16 %v440_v46, %v440_v46 }
  0xaf   : > { %v481_v52 = vpack.c.bf16 %v394_v51, %v345_v48 }
  0xb0   : > { %512 = vst [vmem:[%s1055_s23 + $0x14] sm:$0xf] %v480_v50 }
  0xb1   : > { %513 = vst [vmem:[%s1055_s23 + $0x18] sm:$0xff] %v481_v52  ;;  %v374_v53 = vpop.f32.mrf.mxu3 }
  0xb2   : > { %v375_v35 = vadd.f32 %v374_v53, %v1045_v27 }
  0xb3   : > { %v442_v54 = vpop.f32.mrf.mxu2  ;;  %v346_v56 = vpop.f32.mrf.mxu0 }
  0xb4   : > { %v443_v55 = vadd.f32 %v442_v54, %v1053_v34  ;;  %v347_v57 = vadd.f32 %v346_v56, %v1045_v27  ;;  %v395_v58 = vpop.f32.mrf.mxu1 }
  0xb5   : > { %v396_v60 = vadd.f32 %v395_v58, %v1047_v28 }
  0xb6   : > { %v482_v59 = vpack.c.bf16 %v443_v55, %v443_v55 }
  0xb7   : > { %v483_v61 = vpack.c.bf16 %v396_v60, %v347_v57 }
  0xb8   : > { %514 = vst [vmem:[%s1055_s23 + $0x20] sm:$0xf] %v482_v59 }
  0xb9   : > { %515 = vst [vmem:[%s1055_s23 + $0x24] sm:$0xff] %v483_v61  ;;  %v376_v62 = vpop.f32.mrf.mxu3 }
  0xba   : > { %v377_v47 = vadd.f32 %v376_v62, %v1045_v27 }
  0xbb   : > { %v444_v63 = vpop.f32.mrf.mxu2  ;;  %v349_v1 = vpop.f32.mrf.mxu0 }
  0xbc   : > { %v445_v0 = vadd.f32 %v444_v63, %v1053_v34  ;;  %v350_v2 = vadd.f32 %v349_v1, %v1045_v27  ;;  %v398_v3 = vpop.f32.mrf.mxu1 }
  0xbd   : > { %v399_v5 = vadd.f32 %v398_v3, %v1047_v28 }
  0xbe   : > { %v484_v4 = vpack.c.bf16 %v445_v0, %v445_v0 }
  0xbf   : > { %v485_v6 = vpack.c.bf16 %v399_v5, %v350_v2 }
  0xc0   : > { %516 = vst [vmem:[%s1055_s23 + $0x2c] sm:$0xf] %v484_v4 }
  0xc1   : > { %517 = vst [vmem:[%s1055_s23 + $0x30] sm:$0xff] %v485_v6  ;;  %v418_v7 = vpop.f32.mrf.mxu3 }
  0xc2   : > { %v419_v9 = vadd.f32 %v418_v7, %v1047_v28 }
  0xc3   : > { %v447_v10 = vpop.f32.mrf.mxu2  ;;  %v351_v12 = vpop.f32.mrf.mxu0 }
  0xc4   : > { %v448_v11 = vadd.f32 %v447_v10, %v1053_v34  ;;  %v501_v13 = vpack.c.bf16 %v419_v9, %v370_v8  ;;  %v352_v14 = vadd.f32 %v351_v12, %v1045_v27  ;;  %v400_v15 = vpop.f32.mrf.mxu1 }
  0xc5   : > { %v401_v17 = vadd.f32 %v400_v15, %v1047_v28 }
  0xc6   : > { %v486_v16 = vpack.c.bf16 %v448_v11, %v448_v11  ;;  %533 = vst [vmem:[%s1055_s23 + $0x90] sm:$0xff] %v501_v13 }
  0xc7   : > { %v487_v18 = vpack.c.bf16 %v401_v17, %v352_v14 }
  0xc8   : > { %518 = vst [vmem:[%s1055_s23 + $0x38] sm:$0xf] %v486_v16 }
  0xc9   : > { %519 = vst [vmem:[%s1055_s23 + $0x3c] sm:$0xff] %v487_v18  ;;  %v420_v19 = vpop.f32.mrf.mxu3 }
  0xca   : > { %v421_v21 = vadd.f32 %v420_v19, %v1047_v28 }
  0xcb   : > { %v449_v22 = vpop.f32.mrf.mxu2  ;;  %v354_v24 = vpop.f32.mrf.mxu0 }
  0xcc   : > { %v450_v23 = vadd.f32 %v449_v22, %v1053_v34  ;;  %v503_v25 = vpack.c.bf16 %v421_v21, %v372_v20  ;;  %v355_v26 = vadd.f32 %v354_v24, %v1045_v27  ;;  %v403_v29 = vpop.f32.mrf.mxu1 }
  0xcd   : > { %v404_v31 = vadd.f32 %v403_v29, %v1047_v28 }
  0xce   : > { %v488_v30 = vpack.c.bf16 %v450_v23, %v450_v23  ;;  %535 = vst [vmem:[%s1055_s23 + $0x9c] sm:$0xff] %v503_v25 }
  0xcf   : > { %v489_v32 = vpack.c.bf16 %v404_v31, %v355_v26 }
  0xd0   : > { %520 = vst [vmem:[%s1055_s23 + $0x44] sm:$0xf] %v488_v30 }
  0xd1   : > { %521 = vst [vmem:[%s1055_s23 + $0x48] sm:$0xff] %v489_v32  ;;  %v423_v33 = vpop.f32.mrf.mxu3 }
  0xd2   : > { %v424_v36 = vadd.f32 %v423_v33, %v1047_v28 }
  0xd3   : > { %v452_v37 = vpop.f32.mrf.mxu2  ;;  %v356_v39 = vpop.f32.mrf.mxu0 }
  0xd4   : > { %v453_v38 = vadd.f32 %v452_v37, %v1053_v34  ;;  %v505_v40 = vpack.c.bf16 %v424_v36, %v375_v35  ;;  %v357_v41 = vadd.f32 %v356_v39, %v1045_v27  ;;  %v405_v42 = vpop.f32.mrf.mxu1 }
  0xd5   : > { %v406_v44 = vadd.f32 %v405_v42, %v1047_v28 }
  0xd6   : > { %v490_v43 = vpack.c.bf16 %v453_v38, %v453_v38  ;;  %537 = vst [vmem:[%s1055_s23 + $0xa8] sm:$0xff] %v505_v40 }
  0xd7   : > { %v491_v45 = vpack.c.bf16 %v406_v44, %v357_v41 }
  0xd8   : > { %522 = vst [vmem:[%s1055_s23 + $0x50] sm:$0xf] %v490_v43 }
  0xd9   : > { %523 = vst [vmem:[%s1055_s23 + $0x54] sm:$0xff] %v491_v45  ;;  %v425_v46 = vpop.f32.mrf.mxu3 }
  0xda   : > { %v426_v48 = vadd.f32 %v425_v46, %v1047_v28 }
  0xdb   : > { %v454_v49 = vpop.f32.mrf.mxu2  ;;  %v359_v51 = vpop.f32.mrf.mxu0 }
  0xdc   : > { %v455_v50 = vadd.f32 %v454_v49, %v1053_v34  ;;  %v507_v52 = vpack.c.bf16 %v426_v48, %v377_v47  ;;  %v360_v53 = vadd.f32 %v359_v51, %v1045_v27  ;;  %v408_v54 = vpop.f32.mrf.mxu1 }
  0xdd   : > { %v409_v56 = vadd.f32 %v408_v54, %v1047_v28 }
  0xde   : > { %v492_v55 = vpack.c.bf16 %v455_v50, %v455_v50  ;;  %539 = vst [vmem:[%s1055_s23 + $0xb4] sm:$0xff] %v507_v52 }
  0xdf   : > { %v493_v57 = vpack.c.bf16 %v409_v56, %v360_v53 }
  0xe0   : > { %524 = vst [vmem:[%s1055_s23 + $0x5c] sm:$0xf] %v492_v55 }
  0xe1   : > { %525 = vst [vmem:[%s1055_s23 + $0x60] sm:$0xff] %v493_v57  ;;  %v467_v58 = vpop.f32.mrf.mxu3 }
  0xe2   : > { %v468_v60 = vadd.f32 %v467_v58, %v1053_v34 }
  0xe3   : > { %v457_v59 = vpop.f32.mrf.mxu2  ;;  %v361_v62 = vpop.f32.mrf.mxu0 }
  0xe4   : > { %v458_v61 = vadd.f32 %v457_v59, %v1053_v34  ;;  %v502_v63 = vpack.c.bf16 %v468_v60, %v468_v60  ;;  %v362_v0 = vadd.f32 %v361_v62, %v1045_v27  ;;  %v410_v1 = vpop.f32.mrf.mxu1 }
  0xe5   : > { %v411_v3 = vadd.f32 %v410_v1, %v1047_v28 }
  0xe6   : > { %v494_v2 = vpack.c.bf16 %v458_v61, %v458_v61  ;;  %534 = vst [vmem:[%s1055_s23 + $0x98] sm:$0xf] %v502_v63 }
  0xe7   : > { %v495_v4 = vpack.c.bf16 %v411_v3, %v362_v0 }
  0xe8   : > { %526 = vst [vmem:[%s1055_s23 + $0x68] sm:$0xf] %v494_v2 }
  0xe9   : > { %527 = vst [vmem:[%s1055_s23 + $0x6c] sm:$0xff] %v495_v4  ;;  %v469_v5 = vpop.f32.mrf.mxu3 }
  0xea   : > { %v470_v7 = vadd.f32 %v469_v5, %v1053_v34 }
  0xeb   : > { %v459_v6 = vpop.f32.mrf.mxu2  ;;  %v364_v9 = vpop.f32.mrf.mxu0 }
  0xec   : > { %v460_v8 = vadd.f32 %v459_v6, %v1053_v34  ;;  %v504_v10 = vpack.c.bf16 %v470_v7, %v470_v7  ;;  %v365_v11 = vadd.f32 %v364_v9, %v1045_v27  ;;  %v413_v12 = vpop.f32.mrf.mxu1 }
  0xed   : > { %v414_v14 = vadd.f32 %v413_v12, %v1047_v28 }
  0xee   : > { %v496_v13 = vpack.c.bf16 %v460_v8, %v460_v8  ;;  %536 = vst [vmem:[%s1055_s23 + $0xa4] sm:$0xf] %v504_v10 }
  0xef   : > { %v497_v15 = vpack.c.bf16 %v414_v14, %v365_v11 }
  0xf0   : > { %528 = vst [vmem:[%s1055_s23 + $0x74] sm:$0xf] %v496_v13 }
  0xf1   : > { %529 = vst [vmem:[%s1055_s23 + $0x78] sm:$0xff] %v497_v15  ;;  %v472_v16 = vpop.f32.mrf.mxu3 }
  0xf2   : > { %v473_v18 = vadd.f32 %v472_v16, %v1053_v34 }
  0xf3   : > { %v462_v17 = vpop.f32.mrf.mxu2  ;;  %v366_v20 = vpop.f32.mrf.mxu0 }
  0xf4   : > { %v463_v19 = vadd.f32 %v462_v17, %v1053_v34  ;;  %v506_v21 = vpack.c.bf16 %v473_v18, %v473_v18  ;;  %v367_v22 = vadd.f32 %v366_v20, %v1045_v27  ;;  %v415_v23 = vpop.f32.mrf.mxu1 }
  0xf5   : > { %v416_v25 = vadd.f32 %v415_v23, %v1047_v28 }
  0xf6   : > { %v498_v24 = vpack.c.bf16 %v463_v19, %v463_v19  ;;  %538 = vst [vmem:[%s1055_s23 + $0xb0] sm:$0xf] %v506_v21 }
  0xf7   : > { %v499_v26 = vpack.c.bf16 %v416_v25, %v367_v22 }
  0xf8   : > { %530 = vst [vmem:[%s1055_s23 + $0x80] sm:$0xf] %v498_v24 }
  0xf9   : > { %531 = vst [vmem:[%s1055_s23 + $0x84] sm:$0xff] %v499_v26  ;;  %v474_v29 = vpop.f32.mrf.mxu3 }
  0xfa   : > { %v475_v30 = vadd.f32 %v474_v29, %v1053_v34 }
  0xfb   : > { %v464_v27 = vpop.f32.mrf.mxu2 }
  0xfc   : > { %v465_v28 = vadd.f32 %v464_v27, %v1053_v34  ;;  %v508_v31 = vpack.c.bf16 %v475_v30, %v475_v30 }
  0xfe   : > { %v500_v32 = vpack.c.bf16 %v465_v28, %v465_v28  ;;  %540 = vst [vmem:[%s1055_s23 + $0xbc] sm:$0xf] %v508_v31 }
 0x100   : > { %532 = vst [vmem:[%s1055_s23 + $0x8c] sm:$0xf] %v500_v32 }
 0x101   : > { %836 = shalt.err (!%p833_p5)
}
 0x102   : > { %s889_s18 = smov 192   ;;  %s890_s19 = smov 12  }
 0x103   : > { %752 = dma.vmem_to_hbm [thread:$0]  (%p951_p4), %s558_s15, 3072, %s560_s30, %s542_s4, %s889_s18, %s889_s18, %s890_s19  }
 0x104 PF: > { %p758_p6 = scmp.ge.s32.totalorder %s887_s17, 2  ;;  %s574_s21 = sand.u32 1, %s867_s12  }
 0x105   : > { %s575_s23 = scalar_lea.sflag [#allocation3], %s574_s21 }
 0x106   : > { %p755_p7 = pnand %p758_p6, %p958_p8 }
 0x108   : > { %p756_p9 = pneg %p755_p7 }
 0x10a   : > { %862 = dma.done.wait (%p756_p9), %s575_s23, 3072  }
 0x10b   : > { %864 = vsyncadd (%p756_p9), %s575_s23, 4294964224  ;;  %s16_s17 = sadd.s32 1, %s887_s17   ;;  %s1180_s12 = smov %s871_s13 }
 0x10c   : > { %p13_p10 = scmp.ge.s32.totalorder %s16_s17, 4   ;;  %s1181_s13 = smov %s875_s14 }
 0x10d   : > { %s1182_s14 = smov %s964_s25  ;;  %s1183_s15 = smov %s883_s16 }
 0x10e   : > { %s1184_s16 = smov %s1186_s20  ;;  %15 = sbr.rel (!%p13_p10) target bundleno = 4 (0x4), region = 67 }
 0x113   :  { %581 = vsyncpa [#allocation3], 1 }
 0x114   :  { %583 = vsyncpa [#allocation3 + $0x1], 1 }

</bundles_post_ra>
